<compile_context>
chip_gen: v5e
topology: v5e:2x2
jax: 0.10.0
libtpu: 0.0.40
codegen_flags: <defaults>
</compile_context>

<pallas_src>
import jax
import jax.numpy as jnp
from jax.experimental import pallas as pl
from jax.experimental.pallas import tpu as pltpu


def _sigmoid(x):
    # tanh-based sigmoid: mathematically identical, guaranteed EUP lowering on all TPU gens.
    return 0.5 * (jnp.tanh(0.5 * x) + 1.0)


def _make_query_encoder_kernel(num_layers, hidden, vocab):
    L, H, V = num_layers, hidden, vocab

    def kernel(tok_ref, len_ref, emb_ref, *rest):
        # tok_ref : (1, TB, 1) int32   token ids at the current timestep
        # len_ref : (TB, 1)    int32   valid lengths per sequence
        # emb_ref : (V, E)             embedding table (resident block)
        # rest    : [w_ih_t, w_hh_t, bias] * L, out_ref, h_sc, c_sc, o_sc
        w_refs = rest[: 3 * L]
        out_ref = rest[3 * L]
        h_sc, c_sc, o_sc = rest[3 * L + 1:]

        t = pl.program_id(1)

        @pl.when(t == 0)
        def _init():
            h_sc[...] = jnp.zeros_like(h_sc)
            c_sc[...] = jnp.zeros_like(c_sc)
            o_sc[...] = jnp.zeros_like(o_sc)

        # ---- embedding lookup: exact one-hot matmul on the MXU ----
        tok = tok_ref[0]                                          # (TB, 1) int32
        tb = tok.shape[0]
        onehot = (tok == jax.lax.broadcasted_iota(jnp.int32, (tb, V), 1)
                  ).astype(emb_ref.dtype)                         # (TB, V)
        x = jnp.dot(onehot, emb_ref[...],
                    preferred_element_type=jnp.float32)           # (TB, E) f32

        # ---- stacked LSTM cell for this timestep (unrolled over layers) ----
        for l in range(L):
            w_ih = w_refs[3 * l][...]       # (in_dim, 4H)  pre-transposed
            w_hh = w_refs[3 * l + 1][...]   # (H, 4H)       pre-transposed
            bias = w_refs[3 * l + 2][...]   # (1, 4H) == b_ih + b_hh
            h_prev = h_sc[l]                # (TB, H)
            c_prev = c_sc[l]                # (TB, H)
            gates = (jnp.dot(x, w_ih, preferred_element_type=jnp.float32)
                     + jnp.dot(h_prev, w_hh, preferred_element_type=jnp.float32)
                     + bias)                                      # (TB, 4H)
            i_g = _sigmoid(gates[:, 0 * H:1 * H])
            f_g = _sigmoid(gates[:, 1 * H:2 * H])
            g_g = jnp.tanh(gates[:, 2 * H:3 * H])
            o_g = _sigmoid(gates[:, 3 * H:4 * H])
            c_new = f_g * c_prev + i_g * g_g
            h_new = o_g * jnp.tanh(c_new)
            h_sc[l] = h_new
            c_sc[l] = c_new
            x = h_new                        # feeds the next layer

        # ---- keep the last-layer output at each sequence's final valid timestep ----
        take = (len_ref[...] - 1) == t                            # (TB, 1) bool
        o_sc[...] = jnp.where(take, x, o_sc[...])
        out_ref[...] = o_sc[...].astype(out_ref.dtype)

    return kernel


def _pick_batch_tile(batch):
    # Keep double-buffered streamed blocks + per-tile state well under the v7x
    # 64 MiB VMEM (32 MiB default scoped limit); tiles must be a multiple of 8
    # (sublane) unless they cover the whole batch.
    if batch <= 8 or batch % 8 != 0:
        return batch
    for cand in (128, 64, 32, 16, 8):
        if batch % cand == 0:
            return cand
    return batch


def query_encoder_forward(input_ids, lengths, emb_table, layer_params):
    """QueryEncoder forward.

    input_ids   : (B, T) int32 padded token ids
    lengths     : (B,)   int32 valid lengths (>= 1)
    emb_table   : (V, E) embedding table
    layer_params: list of (w_ih_t, w_hh_t, bias) per LSTM layer with
                  w_ih_t : (E or H, 4H)  == PyTorch weight_ih_l{k}.T
                  w_hh_t : (H, 4H)       == PyTorch weight_hh_l{k}.T
                  bias   : (4H,)         == bias_ih_l{k} + bias_hh_l{k}
    returns     : (B, H) last-valid-step hidden states, ordered by descending
                  length (matching the PyTorch module, which never un-permutes).
    """
    B, T = input_ids.shape
    V, E = emb_table.shape
    L = len(layer_params)
    H = layer_params[0][1].shape[0]

    # sort by descending length, like sort_embeddings()
    order = jnp.argsort(-lengths)
    input_ids = jnp.take(input_ids, order, axis=0)
    lengths = jnp.take(lengths, order, axis=0)

    tok_tb1 = input_ids.T.reshape(T, B, 1).astype(jnp.int32)   # time-major token stream
    len_b1 = lengths.reshape(B, 1).astype(jnp.int32)

    TB = _pick_batch_tile(B)
    nb = B // TB

    def const_spec(shape):
        return pl.BlockSpec(shape, lambda b, t: (0, 0))        # resident block

    in_specs = [
        pl.BlockSpec((1, TB, 1), lambda b, t: (t, b, 0)),      # tokens, streamed over T
        pl.BlockSpec((TB, 1), lambda b, t: (b, 0)),            # lengths per batch tile
        const_spec((V, E)),                                    # embedding table
    ]
    args = [tok_tb1, len_b1, emb_table]
    for (w_ih_t, w_hh_t, bias) in layer_params:
        in_specs += [const_spec(w_ih_t.shape),
                     const_spec(w_hh_t.shape),
                     const_spec((1, 4 * H))]
        args += [w_ih_t, w_hh_t, bias.reshape(1, 4 * H)]

    kernel = _make_query_encoder_kernel(L, H, V)

    return pl.pallas_call(
        kernel,
        out_shape=jax.ShapeDtypeStruct((B, H), emb_table.dtype),
        grid_spec=pltpu.PrefetchScalarGridSpec(
            num_scalar_prefetch=0,
            grid=(nb, T),
            in_specs=in_specs,
            out_specs=pl.BlockSpec((TB, H), lambda b, t: (b, 0)),
            scratch_shapes=[
                pltpu.VMEM((L, TB, H), jnp.float32),   # h state per layer
                pltpu.VMEM((L, TB, H), jnp.float32),   # c state per layer
                pltpu.VMEM((TB, H), jnp.float32),      # output accumulator
            ],
        ),
        compiler_params=pltpu.CompilerParams(
            # batch tiles are independent -> "parallel" (shards across v7x's 2 TCs);
            # the T axis carries the LSTM recurrence -> "arbitrary" (sequential).
            dimension_semantics=("parallel", "arbitrary")),
    )(*args)


def query_encoder_reference(input_ids, lengths, emb_table, layer_params):
    """Pure-JAX reference with identical math (for correctness checking)."""
    order = jnp.argsort(-lengths)
    input_ids = jnp.take(input_ids, order, axis=0)
    lengths = jnp.take(lengths, order, axis=0)

    B, T = input_ids.shape
    L = len(layer_params)
    H = layer_params[0][1].shape[0]

    X = jnp.take(emb_table, input_ids, axis=0).astype(jnp.float32)   # (B, T, E)
    h = [jnp.zeros((B, H), jnp.float32) for _ in range(L)]
    c = [jnp.zeros((B, H), jnp.float32) for _ in range(L)]
    per_step = []
    for t in range(T):
        x = X[:, t, :]
        for l, (w_ih_t, w_hh_t, bias) in enumerate(layer_params):
            gates = x @ w_ih_t + h[l] @ w_hh_t + bias
            i_g = _sigmoid(gates[:, :H])
            f_g = _sigmoid(gates[:, H:2 * H])
            g_g = jnp.tanh(gates[:, 2 * H:3 * H])
            o_g = _sigmoid(gates[:, 3 * H:])
            c[l] = f_g * c[l] + i_g * g_g
            h[l] = o_g * jnp.tanh(c[l])
            x = h[l]
        per_step.append(x)
    out_seq = jnp.stack(per_step, axis=0)              # (T, B, H)
    return out_seq[lengths - 1, jnp.arange(B)]         # (B, H), sorted order


if __name__ == "__main__":
    # Small shapes consistent with the module: batch=2, seq=8, vocab=50,
    # embedding_size=32, hidden_size=32, rnn_layers=2.
    B, T, V, E, H, L = 2, 8, 50, 32, 32, 2

    key = jax.random.PRNGKey(0)
    keys = jax.random.split(key, 2 + 3 * L)
    k_tok, k_emb = keys[0], keys[1]
    k_layers = keys[2:]

    input_ids = jax.random.randint(k_tok, (B, T), 0, V, dtype=jnp.int32)
    lengths = jnp.array([5, 8], dtype=jnp.int32)            # valid lengths in [1, T]

    emb_table = jax.random.normal(k_emb, (V, E), dtype=jnp.float32)  # nn.Embedding ~ N(0,1)

    bound = 1.0 / (H ** 0.5)                                 # PyTorch LSTM init bound
    layer_params = []
    for l in range(L):
        in_dim = E if l == 0 else H
        k_ih, k_hh, k_b = k_layers[3 * l: 3 * l + 3]
        w_ih_t = jax.random.uniform(k_ih, (in_dim, 4 * H), jnp.float32, -bound, bound)
        w_hh_t = jax.random.uniform(k_hh, (H, 4 * H), jnp.float32, -bound, bound)
        bias = jax.random.uniform(k_b, (4 * H,), jnp.float32, -bound, bound)  # b_ih+b_hh folded
        layer_params.append((w_ih_t, w_hh_t, bias))

    out = query_encoder_forward(input_ids, lengths, emb_table, layer_params)
    out = jax.block_until_ready(out)

    ref = query_encoder_reference(input_ids, lengths, emb_table, layer_params)
    assert out.shape == (B, H)
    assert jnp.allclose(out, ref, atol=1e-3, rtol=1e-3), "mismatch vs reference"

    print("KERNEL_OK")
</pallas_src>

<mosaic_0001>
module attributes {stable_mosaic.version = 11 : i64} {
  func.func @kernel(%arg0: i32, %arg1: i32, %arg2: memref<1x2x1xi32, #tpu.memory_space<vmem>>, %arg3: memref<2x1xi32, #tpu.memory_space<vmem>>, %arg4: memref<50x32xf32, #tpu.memory_space<vmem>>, %arg5: memref<32x128xf32, #tpu.memory_space<vmem>>, %arg6: memref<32x128xf32, #tpu.memory_space<vmem>>, %arg7: memref<1x128xf32, #tpu.memory_space<vmem>>, %arg8: memref<32x128xf32, #tpu.memory_space<vmem>>, %arg9: memref<32x128xf32, #tpu.memory_space<vmem>>, %arg10: memref<1x128xf32, #tpu.memory_space<vmem>>, %arg11: memref<2x32xf32, #tpu.memory_space<vmem>>, %arg12: memref<2x2x32xf32, #tpu.memory_space<vmem>>, %arg13: memref<2x2x32xf32, #tpu.memory_space<vmem>>, %arg14: memref<2x32xf32, #tpu.memory_space<vmem>>) attributes {dimension_semantics = [#tpu.dimension_semantics<parallel>, #tpu.dimension_semantics<arbitrary>], iteration_bounds = array<i64: 1, 8>, scalar_prefetch = 0 : i64, scratch_operands = 3 : i64, tpu.core_type = #tpu.core_type<tc>, window_params = [{transform_indices = @transform_0, window_bounds = array<i64: 1, 2, 1>}, {transform_indices = @transform_1, window_bounds = array<i64: 2, 1>}, {pipeline_mode = #tpu.pipeline_mode<synchronous>, transform_indices = @transform_2, window_bounds = array<i64: 50, 32>}, {pipeline_mode = #tpu.pipeline_mode<synchronous>, transform_indices = @transform_3, window_bounds = array<i64: 32, 128>}, {pipeline_mode = #tpu.pipeline_mode<synchronous>, transform_indices = @transform_4, window_bounds = array<i64: 32, 128>}, {pipeline_mode = #tpu.pipeline_mode<synchronous>, transform_indices = @transform_5, window_bounds = array<i64: 1, 128>}, {pipeline_mode = #tpu.pipeline_mode<synchronous>, transform_indices = @transform_6, window_bounds = array<i64: 32, 128>}, {pipeline_mode = #tpu.pipeline_mode<synchronous>, transform_indices = @transform_7, window_bounds = array<i64: 32, 128>}, {pipeline_mode = #tpu.pipeline_mode<synchronous>, transform_indices = @transform_8, window_bounds = array<i64: 1, 128>}, {transform_indices = @transform_9, window_bounds = array<i64: 2, 32>}]} {
    %c0_i32 = arith.constant 0 : i32
    %0 = arith.cmpi eq, %arg1, %c0_i32 : i32
    %1 = arith.extui %0 : i1 to i32
    %c0_i32_0 = arith.constant 0 : i32
    %2 = arith.cmpi ne, %1, %c0_i32_0 : i32
    scf.if %2 {
      %cst_72 = arith.constant 0.000000e+00 : f32
      %122 = vector.broadcast %cst_72 : f32 to vector<2x2x32xf32>
      %c0_73 = arith.constant 0 : index
      %c0_74 = arith.constant 0 : index
      %c0_75 = arith.constant 0 : index
      %123 = vector.load %arg12[%c0_73, %c0_74, %c0_75] : memref<2x2x32xf32, #tpu.memory_space<vmem>>, vector<2x2x32xf32>
      tpu.vector_store %arg12[%c0_73, %c0_74, %c0_75], %122 {strides = array<i32>} : memref<2x2x32xf32, #tpu.memory_space<vmem>>, vector<2x2x32xf32>,
      %cst_76 = arith.constant 0.000000e+00 : f32
      %124 = vector.broadcast %cst_76 : f32 to vector<2x2x32xf32>
      %c0_77 = arith.constant 0 : index
      %c0_78 = arith.constant 0 : index
      %c0_79 = arith.constant 0 : index
      %125 = vector.load %arg13[%c0_77, %c0_78, %c0_79] : memref<2x2x32xf32, #tpu.memory_space<vmem>>, vector<2x2x32xf32>
      tpu.vector_store %arg13[%c0_77, %c0_78, %c0_79], %124 {strides = array<i32>} : memref<2x2x32xf32, #tpu.memory_space<vmem>>, vector<2x2x32xf32>,
      %cst_80 = arith.constant 0.000000e+00 : f32
      %126 = vector.broadcast %cst_80 : f32 to vector<2x32xf32>
      %c0_81 = arith.constant 0 : index
      %c0_82 = arith.constant 0 : index
      %127 = vector.load %arg14[%c0_81, %c0_82] : memref<2x32xf32, #tpu.memory_space<vmem>>, vector<2x32xf32>
      tpu.vector_store %arg14[%c0_81, %c0_82], %126 {strides = array<i32>} : memref<2x32xf32, #tpu.memory_space<vmem>>, vector<2x32xf32>,
    } else {
    }
    %c0 = arith.constant 0 : index
    %c0_1 = arith.constant 0 : index
    %c0_2 = arith.constant 0 : index
    %3 = vector.load %arg2[%c0, %c0_1, %c0_2] : memref<1x2x1xi32, #tpu.memory_space<vmem>>, vector<1x2x1xi32>
    %4 = vector.shape_cast %3 : vector<1x2x1xi32> to vector<2x1xi32>
    %5 = tpu.iota {dimensions = array<i32: 1>} : vector<2x50xi32>
    %6 = vector.broadcast %4 : vector<2x1xi32> to vector<2x50xi32>
    %7 = arith.cmpi eq, %6, %5 : vector<2x50xi32>
    %8 = arith.extui %7 : vector<2x50xi1> to vector<2x50xi32>
    %9 = arith.sitofp %8 : vector<2x50xi32> to vector<2x50xf32>
    %c0_3 = arith.constant 0 : index
    %c0_4 = arith.constant 0 : index
    %10 = vector.load %arg4[%c0_3, %c0_4] : memref<50x32xf32, #tpu.memory_space<vmem>>, vector<50x32xf32>
    %cst = arith.constant dense<0.000000e+00> : vector<2x32xf32>
    %11 = tpu.matmul %9, %10, %cst {dimension_numbers = #tpu.dot_dimension_numbers<[1], [0], [0], [1], [0, 0, 1, 1], [], []>} : vector<2x50xf32>, vector<50x32xf32>, vector<2x32xf32> -> vector<2x32xf32>
    %c0_5 = arith.constant 0 : index
    %c0_6 = arith.constant 0 : index
    %12 = vector.load %arg5[%c0_5, %c0_6] : memref<32x128xf32, #tpu.memory_space<vmem>>, vector<32x128xf32>
    %c0_7 = arith.constant 0 : index
    %c0_8 = arith.constant 0 : index
    %13 = vector.load %arg6[%c0_7, %c0_8] : memref<32x128xf32, #tpu.memory_space<vmem>>, vector<32x128xf32>
    %c0_9 = arith.constant 0 : index
    %c0_10 = arith.constant 0 : index
    %14 = vector.load %arg7[%c0_9, %c0_10] : memref<1x128xf32, #tpu.memory_space<vmem>>, vector<1x128xf32>
    %c0_11 = arith.constant 0 : index
    %c0_12 = arith.constant 0 : index
    %c0_13 = arith.constant 0 : index
    %15 = vector.load %arg12[%c0_11, %c0_12, %c0_13] : memref<2x2x32xf32, #tpu.memory_space<vmem>>, vector<1x2x32xf32>
    %16 = vector.shape_cast %15 : vector<1x2x32xf32> to vector<2x32xf32>
    %c0_14 = arith.constant 0 : index
    %c0_15 = arith.constant 0 : index
    %c0_16 = arith.constant 0 : index
    %17 = vector.load %arg13[%c0_14, %c0_15, %c0_16] : memref<2x2x32xf32, #tpu.memory_space<vmem>>, vector<1x2x32xf32>
    %18 = vector.shape_cast %17 : vector<1x2x32xf32> to vector<2x32xf32>
    %cst_17 = arith.constant dense<0.000000e+00> : vector<2x128xf32>
    %19 = tpu.matmul %11, %12, %cst_17 {dimension_numbers = #tpu.dot_dimension_numbers<[1], [0], [0], [1], [0, 0, 1, 1], [], []>} : vector<2x32xf32>, vector<32x128xf32>, vector<2x128xf32> -> vector<2x128xf32>
    %cst_18 = arith.constant dense<0.000000e+00> : vector<2x128xf32>
    %20 = tpu.matmul %16, %13, %cst_18 {dimension_numbers = #tpu.dot_dimension_numbers<[1], [0], [0], [1], [0, 0, 1, 1], [], []>} : vector<2x32xf32>, vector<32x128xf32>, vector<2x128xf32> -> vector<2x128xf32>
    %21 = arith.addf %19, %20 : vector<2x128xf32>
    %22 = vector.broadcast %14 : vector<1x128xf32> to vector<2x128xf32>
    %23 = arith.addf %21, %22 : vector<2x128xf32>
    %24 = vector.extract_strided_slice %23 {offsets = [0, 0], sizes = [2, 32], strides = [1, 1]} : vector<2x128xf32> to vector<2x32xf32>
    %cst_19 = arith.constant 5.000000e-01 : f32
    %25 = vector.broadcast %cst_19 : f32 to vector<2x32xf32>
    %26 = arith.mulf %25, %24 : vector<2x32xf32>
    %27 = math.tanh %26 : vector<2x32xf32>
    %cst_20 = arith.constant 1.000000e+00 : f32
    %28 = vector.broadcast %cst_20 : f32 to vector<2x32xf32>
    %29 = arith.addf %27, %28 : vector<2x32xf32>
    %cst_21 = arith.constant 5.000000e-01 : f32
    %30 = vector.broadcast %cst_21 : f32 to vector<2x32xf32>
    %31 = arith.mulf %30, %29 : vector<2x32xf32>
    %32 = vector.extract_strided_slice %23 {offsets = [0, 32], sizes = [2, 32], strides = [1, 1]} : vector<2x128xf32> to vector<2x32xf32>
    %cst_22 = arith.constant 5.000000e-01 : f32
    %33 = vector.broadcast %cst_22 : f32 to vector<2x32xf32>
    %34 = arith.mulf %33, %32 : vector<2x32xf32>
    %35 = math.tanh %34 : vector<2x32xf32>
    %cst_23 = arith.constant 1.000000e+00 : f32
    %36 = vector.broadcast %cst_23 : f32 to vector<2x32xf32>
    %37 = arith.addf %35, %36 : vector<2x32xf32>
    %cst_24 = arith.constant 5.000000e-01 : f32
    %38 = vector.broadcast %cst_24 : f32 to vector<2x32xf32>
    %39 = arith.mulf %38, %37 : vector<2x32xf32>
    %40 = vector.extract_strided_slice %23 {offsets = [0, 64], sizes = [2, 32], strides = [1, 1]} : vector<2x128xf32> to vector<2x32xf32>
    %41 = math.tanh %40 : vector<2x32xf32>
    %42 = vector.extract_strided_slice %23 {offsets = [0, 96], sizes = [2, 32], strides = [1, 1]} : vector<2x128xf32> to vector<2x32xf32>
    %cst_25 = arith.constant 5.000000e-01 : f32
    %43 = vector.broadcast %cst_25 : f32 to vector<2x32xf32>
    %44 = arith.mulf %43, %42 : vector<2x32xf32>
    %45 = math.tanh %44 : vector<2x32xf32>
    %cst_26 = arith.constant 1.000000e+00 : f32
    %46 = vector.broadcast %cst_26 : f32 to vector<2x32xf32>
    %47 = arith.addf %45, %46 : vector<2x32xf32>
    %cst_27 = arith.constant 5.000000e-01 : f32
    %48 = vector.broadcast %cst_27 : f32 to vector<2x32xf32>
    %49 = arith.mulf %48, %47 : vector<2x32xf32>
    %50 = arith.mulf %39, %18 : vector<2x32xf32>
    %51 = arith.mulf %31, %41 : vector<2x32xf32>
    %52 = arith.addf %50, %51 : vector<2x32xf32>
    %53 = math.tanh %52 : vector<2x32xf32>
    %54 = arith.mulf %49, %53 : vector<2x32xf32>
    %c0_28 = arith.constant 0 : index
    %c0_29 = arith.constant 0 : index
    %c0_30 = arith.constant 0 : index
    %55 = vector.load %arg12[%c0_28, %c0_29, %c0_30] : memref<2x2x32xf32, #tpu.memory_space<vmem>>, vector<1x2x32xf32>
    %56 = vector.shape_cast %55 : vector<1x2x32xf32> to vector<2x32xf32>
    %57 = vector.shape_cast %54 : vector<2x32xf32> to vector<1x2x32xf32>
    tpu.vector_store %arg12[%c0_28, %c0_29, %c0_30], %57 {strides = array<i32>} : memref<2x2x32xf32, #tpu.memory_space<vmem>>, vector<1x2x32xf32>,
    %c0_31 = arith.constant 0 : index
    %c0_32 = arith.constant 0 : index
    %c0_33 = arith.constant 0 : index
    %58 = vector.load %arg13[%c0_31, %c0_32, %c0_33] : memref<2x2x32xf32, #tpu.memory_space<vmem>>, vector<1x2x32xf32>
    %59 = vector.shape_cast %58 : vector<1x2x32xf32> to vector<2x32xf32>
    %60 = vector.shape_cast %52 : vector<2x32xf32> to vector<1x2x32xf32>
    tpu.vector_store %arg13[%c0_31, %c0_32, %c0_33], %60 {strides = array<i32>} : memref<2x2x32xf32, #tpu.memory_space<vmem>>, vector<1x2x32xf32>,
    %c0_34 = arith.constant 0 : index
    %c0_35 = arith.constant 0 : index
    %61 = vector.load %arg8[%c0_34, %c0_35] : memref<32x128xf32, #tpu.memory_space<vmem>>, vector<32x128xf32>
    %c0_36 = arith.constant 0 : index
    %c0_37 = arith.constant 0 : index
    %62 = vector.load %arg9[%c0_36, %c0_37] : memref<32x128xf32, #tpu.memory_space<vmem>>, vector<32x128xf32>
    %c0_38 = arith.constant 0 : index
    %c0_39 = arith.constant 0 : index
    %63 = vector.load %arg10[%c0_38, %c0_39] : memref<1x128xf32, #tpu.memory_space<vmem>>, vector<1x128xf32>
    %c1 = arith.constant 1 : index
    %c0_40 = arith.constant 0 : index
    %c0_41 = arith.constant 0 : index
    %64 = vector.load %arg12[%c1, %c0_40, %c0_41] : memref<2x2x32xf32, #tpu.memory_space<vmem>>, vector<1x2x32xf32>
    %65 = vector.shape_cast %64 : vector<1x2x32xf32> to vector<2x32xf32>
    %c1_42 = arith.constant 1 : index
    %c0_43 = arith.constant 0 : index
    %c0_44 = arith.constant 0 : index
    %66 = vector.load %arg13[%c1_42, %c0_43, %c0_44] : memref<2x2x32xf32, #tpu.memory_space<vmem>>, vector<1x2x32xf32>
    %67 = vector.shape_cast %66 : vector<1x2x32xf32> to vector<2x32xf32>
    %cst_45 = arith.constant dense<0.000000e+00> : vector<2x128xf32>
    %68 = tpu.matmul %54, %61, %cst_45 {dimension_numbers = #tpu.dot_dimension_numbers<[1], [0], [0], [1], [0, 0, 1, 1], [], []>} : vector<2x32xf32>, vector<32x128xf32>, vector<2x128xf32> -> vector<2x128xf32>
    %cst_46 = arith.constant dense<0.000000e+00> : vector<2x128xf32>
    %69 = tpu.matmul %65, %62, %cst_46 {dimension_numbers = #tpu.dot_dimension_numbers<[1], [0], [0], [1], [0, 0, 1, 1], [], []>} : vector<2x32xf32>, vector<32x128xf32>, vector<2x128xf32> -> vector<2x128xf32>
    %70 = arith.addf %68, %69 : vector<2x128xf32>
    %71 = vector.broadcast %63 : vector<1x128xf32> to vector<2x128xf32>
    %72 = arith.addf %70, %71 : vector<2x128xf32>
    %73 = vector.extract_strided_slice %72 {offsets = [0, 0], sizes = [2, 32], strides = [1, 1]} : vector<2x128xf32> to vector<2x32xf32>
    %cst_47 = arith.constant 5.000000e-01 : f32
    %74 = vector.broadcast %cst_47 : f32 to vector<2x32xf32>
    %75 = arith.mulf %74, %73 : vector<2x32xf32>
    %76 = math.tanh %75 : vector<2x32xf32>
    %cst_48 = arith.constant 1.000000e+00 : f32
    %77 = vector.broadcast %cst_48 : f32 to vector<2x32xf32>
    %78 = arith.addf %76, %77 : vector<2x32xf32>
    %cst_49 = arith.constant 5.000000e-01 : f32
    %79 = vector.broadcast %cst_49 : f32 to vector<2x32xf32>
    %80 = arith.mulf %79, %78 : vector<2x32xf32>
    %81 = vector.extract_strided_slice %72 {offsets = [0, 32], sizes = [2, 32], strides = [1, 1]} : vector<2x128xf32> to vector<2x32xf32>
    %cst_50 = arith.constant 5.000000e-01 : f32
    %82 = vector.broadcast %cst_50 : f32 to vector<2x32xf32>
    %83 = arith.mulf %82, %81 : vector<2x32xf32>
    %84 = math.tanh %83 : vector<2x32xf32>
    %cst_51 = arith.constant 1.000000e+00 : f32
    %85 = vector.broadcast %cst_51 : f32 to vector<2x32xf32>
    %86 = arith.addf %84, %85 : vector<2x32xf32>
    %cst_52 = arith.constant 5.000000e-01 : f32
    %87 = vector.broadcast %cst_52 : f32 to vector<2x32xf32>
    %88 = arith.mulf %87, %86 : vector<2x32xf32>
    %89 = vector.extract_strided_slice %72 {offsets = [0, 64], sizes = [2, 32], strides = [1, 1]} : vector<2x128xf32> to vector<2x32xf32>
    %90 = math.tanh %89 : vector<2x32xf32>
    %91 = vector.extract_strided_slice %72 {offsets = [0, 96], sizes = [2, 32], strides = [1, 1]} : vector<2x128xf32> to vector<2x32xf32>
    %cst_53 = arith.constant 5.000000e-01 : f32
    %92 = vector.broadcast %cst_53 : f32 to vector<2x32xf32>
    %93 = arith.mulf %92, %91 : vector<2x32xf32>
    %94 = math.tanh %93 : vector<2x32xf32>
    %cst_54 = arith.constant 1.000000e+00 : f32
    %95 = vector.broadcast %cst_54 : f32 to vector<2x32xf32>
    %96 = arith.addf %94, %95 : vector<2x32xf32>
    %cst_55 = arith.constant 5.000000e-01 : f32
    %97 = vector.broadcast %cst_55 : f32 to vector<2x32xf32>
    %98 = arith.mulf %97, %96 : vector<2x32xf32>
    %99 = arith.mulf %88, %67 : vector<2x32xf32>
    %100 = arith.mulf %80, %90 : vector<2x32xf32>
    %101 = arith.addf %99, %100 : vector<2x32xf32>
    %102 = math.tanh %101 : vector<2x32xf32>
    %103 = arith.mulf %98, %102 : vector<2x32xf32>
    %c1_56 = arith.constant 1 : index
    %c0_57 = arith.constant 0 : index
    %c0_58 = arith.constant 0 : index
    %104 = vector.load %arg12[%c1_56, %c0_57, %c0_58] : memref<2x2x32xf32, #tpu.memory_space<vmem>>, vector<1x2x32xf32>
    %105 = vector.shape_cast %104 : vector<1x2x32xf32> to vector<2x32xf32>
    %106 = vector.shape_cast %103 : vector<2x32xf32> to vector<1x2x32xf32>
    tpu.vector_store %arg12[%c1_56, %c0_57, %c0_58], %106 {strides = array<i32>} : memref<2x2x32xf32, #tpu.memory_space<vmem>>, vector<1x2x32xf32>,
    %c1_59 = arith.constant 1 : index
    %c0_60 = arith.constant 0 : index
    %c0_61 = arith.constant 0 : index
    %107 = vector.load %arg13[%c1_59, %c0_60, %c0_61] : memref<2x2x32xf32, #tpu.memory_space<vmem>>, vector<1x2x32xf32>
    %108 = vector.shape_cast %107 : vector<1x2x32xf32> to vector<2x32xf32>
    %109 = vector.shape_cast %101 : vector<2x32xf32> to vector<1x2x32xf32>
    tpu.vector_store %arg13[%c1_59, %c0_60, %c0_61], %109 {strides = array<i32>} : memref<2x2x32xf32, #tpu.memory_space<vmem>>, vector<1x2x32xf32>,
    %c0_62 = arith.constant 0 : index
    %c0_63 = arith.constant 0 : index
    %110 = vector.load %arg3[%c0_62, %c0_63] : memref<2x1xi32, #tpu.memory_space<vmem>>, vector<2x1xi32>
    %c1_i32 = arith.constant 1 : i32
    %111 = vector.broadcast %c1_i32 : i32 to vector<2x1xi32>
    %112 = arith.subi %110, %111 : vector<2x1xi32>
    %113 = vector.broadcast %arg1 : i32 to vector<2x1xi32>
    %114 = arith.cmpi eq, %112, %113 : vector<2x1xi32>
    %c0_64 = arith.constant 0 : index
    %c0_65 = arith.constant 0 : index
    %115 = vector.load %arg14[%c0_64, %c0_65] : memref<2x32xf32, #tpu.memory_space<vmem>>, vector<2x32xf32>
    %116 = vector.shape_cast %114 : vector<2x1xi1> to vector<2x1xi1>
    %117 = vector.broadcast %116 : vector<2x1xi1> to vector<2x32xi1>
    %118 = arith.select %117, %103, %115 : vector<2x32xi1>, vector<2x32xf32>
    %c0_66 = arith.constant 0 : index
    %c0_67 = arith.constant 0 : index
    %119 = vector.load %arg14[%c0_66, %c0_67] : memref<2x32xf32, #tpu.memory_space<vmem>>, vector<2x32xf32>
    tpu.vector_store %arg14[%c0_66, %c0_67], %118 {strides = array<i32>} : memref<2x32xf32, #tpu.memory_space<vmem>>, vector<2x32xf32>,
    %c0_68 = arith.constant 0 : index
    %c0_69 = arith.constant 0 : index
    %120 = vector.load %arg14[%c0_68, %c0_69] : memref<2x32xf32, #tpu.memory_space<vmem>>, vector<2x32xf32>
    %c0_70 = arith.constant 0 : index
    %c0_71 = arith.constant 0 : index
    %121 = vector.load %arg11[%c0_70, %c0_71] : memref<2x32xf32, #tpu.memory_space<vmem>>, vector<2x32xf32>
    tpu.vector_store %arg11[%c0_70, %c0_71], %120 {strides = array<i32>} : memref<2x32xf32, #tpu.memory_space<vmem>>, vector<2x32xf32>,
    return
  }
  func.func @transform_0(%arg0: i32, %arg1: i32) -> (i32, i32, i32) {
    %c0_i32 = arith.constant 0 : i32
    %c0_i32_0 = arith.constant 0 : i32
    return %arg1, %arg0, %c0_i32 : i32, i32, i32
  }
  func.func @transform_1(%arg0: i32, %arg1: i32) -> (i32, i32) {
    %c0_i32 = arith.constant 0 : i32
    %c0_i32_0 = arith.constant 0 : i32
    return %arg0, %c0_i32 : i32, i32
  }
  func.func @transform_2(%arg0: i32, %arg1: i32) -> (i32, i32) {
    %c0_i32 = arith.constant 0 : i32
    %c0_i32_0 = arith.constant 0 : i32
    %c0_i32_1 = arith.constant 0 : i32
    return %c0_i32, %c0_i32_0 : i32, i32
  }
  func.func @transform_3(%arg0: i32, %arg1: i32) -> (i32, i32) {
    %c0_i32 = arith.constant 0 : i32
    %c0_i32_0 = arith.constant 0 : i32
    %c0_i32_1 = arith.constant 0 : i32
    return %c0_i32, %c0_i32_0 : i32, i32
  }
  func.func @transform_4(%arg0: i32, %arg1: i32) -> (i32, i32) {
    %c0_i32 = arith.constant 0 : i32
    %c0_i32_0 = arith.constant 0 : i32
    %c0_i32_1 = arith.constant 0 : i32
    return %c0_i32, %c0_i32_0 : i32, i32
  }
  func.func @transform_5(%arg0: i32, %arg1: i32) -> (i32, i32) {
    %c0_i32 = arith.constant 0 : i32
    %c0_i32_0 = arith.constant 0 : i32
    %c0_i32_1 = arith.constant 0 : i32
    return %c0_i32, %c0_i32_0 : i32, i32
  }
  func.func @transform_6(%arg0: i32, %arg1: i32) -> (i32, i32) {
    %c0_i32 = arith.constant 0 : i32
    %c0_i32_0 = arith.constant 0 : i32
    %c0_i32_1 = arith.constant 0 : i32
    return %c0_i32, %c0_i32_0 : i32, i32
  }
  func.func @transform_7(%arg0: i32, %arg1: i32) -> (i32, i32) {
    %c0_i32 = arith.constant 0 : i32
    %c0_i32_0 = arith.constant 0 : i32
    %c0_i32_1 = arith.constant 0 : i32
    return %c0_i32, %c0_i32_0 : i32, i32
  }
  func.func @transform_8(%arg0: i32, %arg1: i32) -> (i32, i32) {
    %c0_i32 = arith.constant 0 : i32
    %c0_i32_0 = arith.constant 0 : i32
    %c0_i32_1 = arith.constant 0 : i32
    return %c0_i32, %c0_i32_0 : i32, i32
  }
  func.func @transform_9(%arg0: i32, %arg1: i32) -> (i32, i32) {
    %c0_i32 = arith.constant 0 : i32
    %c0_i32_0 = arith.constant 0 : i32
    return %arg0, %c0_i32 : i32, i32
  }
}

</mosaic_0001>

<bundles_post_ra>
// kernel: tpu_custom_call.1
= control target key start
LH: loop header
LB: loop body
LE: loop exit
PB: predicated region body
PF: predicated region fallthrough
CT: control target
= control target key end

     0   :  { %14 = vsyncpa [#allocation6], 0  ;;  %s1119_s0 = inlined_call_operand.vmem [shape: s32[8,2,1], index: 0, kind: input, shape index: {}]   ;;  %s1120_s1 = inlined_call_operand.vmem [shape: s32[2,1], index: 1, kind: input, shape index: {}]   ;;  %s1121_s2 = inlined_call_operand.vmem [shape: f32[50,32], index: 2, kind: input, shape index: {}]   ;;  %s1122_s3 = inlined_call_operand.vmem [shape: f32[32,128], index: 3, kind: input, shape index: {}]   ;;  %s1123_s4 = inlined_call_operand.vmem [shape: f32[32,128], index: 4, kind: input, shape index: {}]   ;;  %s1124_s5 = inlined_call_operand.vmem [shape: f32[1,128], index: 5, kind: input, shape index: {}]   ;;  %s1125_s6 = inlined_call_operand.vmem [shape: f32[32,128], index: 6, kind: input, shape index: {}]   ;;  %s1126_s7 = inlined_call_operand.hbm [shape: f32[32,128], index: 7, kind: input, shape index: {}]   ;;  %s1127_s8 = inlined_call_operand.vmem [shape: f32[1,128], index: 8, kind: input, shape index: {}]   ;;  %s1128_s9 = inlined_call_operand.hbm [shape: f32[2,32], index: 9, kind: output, shape index: {}]  }
   0x1   :  { %15 = vsyncpa [#allocation7], 0  ;;  %s979_s30 = smov 0   ;;  %s981_s10 = smov 0  }
   0x2   :  { %s983_s11 = smov 0  }
   0x3 LB: > { %s742_s12 = sadd.s32 4294967295, %s917_s11   ;;  %s30_s13 = sadd.s32 1, %s913_s10  ;;  %s917_s11 = sphi %s983_s11, %s21_s11   ;;  %s913_s10 = sphi %s981_s10, %s1130_s10   ;;  %s909_s30 = sphi %s979_s30, %s1129_s30  }
   0x4   : > { %p31_p0 = scmp.ge.s32.totalorder %s30_s13, 8  ;;  %p743_p1 = scmp.ge.s32.totalorder %s917_s11, 1 }
   0x5   : > { %p265_p2 = scmp.lt.s32.totalorder %s917_s11, 9  ;;  %p775_p4 = scmp.eq.s32.totalorder %s742_s12, 0 }
   0x6   : > { %s1132_s13 = smov (%p31_p0, %s30_s13), 0  ;;  %s298_s16 = sshll.u32 %s1126_s7, 4  ;;  %s299_s16 = int_to_ptr.hbm [resolvable:$true] %s298_s16 }
   0x7   : > { %p266_p3 = pnand %p743_p1, %p265_p2  ;;  %s919_s17 = smov [#allocation5]  }
   0x8   : > { %s300_s18 = sshll.u32 %s919_s17, 4  ;;  %s920_s19 = smov 128   ;;  %s301_s18 = int_to_ptr.vmem [resolvable:$true] %s300_s18 }
   0x9   : > { %p771_p5 = pneg %p266_p3  ;;  %s921_s20 = smov 8  }
   0xa   : > { %329 = sbr.rel (%p266_p3) target bundleno = 1443 (0x5a3), region = 56 }
   0xb   : > { %p772_p6 = pnand %p775_p4, %p771_p5 }
   0xd   : > { %774 = dma.hbm_to_vmem [thread:$0]  (!%p772_p6), %s299_s16, 512, %s301_s18, [#allocation6], %s920_s19, %s920_s19, %s921_s20  }
   0xf   : > { %900 = dma.done.wait (%p775_p4), [#allocation6], 512  }
  0x10   : > { %902 = vsyncadd (%p775_p4), [#allocation6], 4294966784  ;;  %p367_p7 = scmp.lt.s32.totalorder %s909_s30, 7  ;;  %p750_p8 = scmp.ne.s32.totalorder %s909_s30, 0 }
  0x12   : > { %s368_s21 = scalar_select %p367_p7, %s909_s30, 7 }
  0x13   : > { %381 = sbr.rel (%p750_p8) target bundleno = 30 (0x1e), region = 64 }
  0x14   : > { %s749_s22 = sshll.u32 %s368_s21, 1 }
  0x15   : > { %s373_s25 = scalar_lea.vmem %s1119_s0, %s749_s22 }
  0x18   : > { %vm382_vm0 = vcmask 254976   ;;  %v922_v0 = vmov 0.0  }
  0x19   : > { %383 = vst.msk [vmem:[#allocation2] sm:$0x3] %vm382_vm0, %v922_v0 }
  0x1a   : > { %384 = vst.msk [vmem:[#allocation2 + $0x2] sm:$0x3] %vm382_vm0, %v922_v0 }
  0x1b   : > { %385 = vst.msk [vmem:[#allocation3] sm:$0x3] %vm382_vm0, %v922_v0 }
  0x1c   : > { %386 = vst.msk [vmem:[#allocation3 + $0x2] sm:$0x3] %vm382_vm0, %v922_v0 }
  0x1d   : > { %387 = vst.msk [vmem:[#allocation4] sm:$0x3] %vm382_vm0, %v922_v0 }
  0x1e PF: > { %v388_v1 = vld [vmem:[%s373_s25] sm:$0x3]  ;;  %v403_v2 = vld [vmem:[%s1121_s2 + $0x30] sm:$0x3]  ;;  %vm408_vm1 = vcmask 1041408   ;;  %v923_v3 = vmov 0   ;;  %v389_v13 = vlaneseq  ;;  %v631_v41 = vstv %s909_s30 }
  0x1f   : > { %813 = vset.pattern.permute.xlu0 %v923_v3  ;;  %752 = vmatpush.msk.msra.mxu0 %vm408_vm1, %v403_v2  ;;  %v402_v4 = vld [vmem:[%s1121_s2 + $0x28] sm:$0xff]  ;;  %v401_v5 = vld [vmem:[%s1121_s2 + $0x20] sm:$0xff]  ;;  %v400_v6 = vld [vmem:[%s1121_s2 + $0x18] sm:$0xff]  ;;  %vm404_vm2 = vcmask 408576   ;;  %v924_v16 = vmov 0.0   ;;  %s925_s24 = smov 32  }
  0x20   : > { %392 = vperm.xlu0 %813, %v388_v1   ;;  %814 = vset.pattern.permute.xlu1 %v923_v3  ;;  %v399_v7 = vld [vmem:[%s1121_s2 + $0x10] sm:$0xff]  ;;  %v398_v8 = vld [vmem:[%s1121_s2 + $0x8] sm:$0xff]  ;;  %v397_v9 = vld [vmem:[%s1121_s2] sm:$0xff]  ;;  %v390_v14 = vand.u32 127, %v389_v13  ;;  %vm443_vm4 = vcmask 261120   ;;  %s926_s27 = smov 64  }
  0x21   : > { %422 = vmatpush.msra.mxu0 %v402_v4  ;;  %v435_v10 = vld [vmem:[%s1122_s3 + $0x18] sm:$0xff]  ;;  %v434_v11 = vld [vmem:[%s1122_s3 + $0x10] sm:$0xff]  ;;  %v433_v12 = vld [vmem:[%s1122_s3 + $0x8] sm:$0xff]  ;;  %s927_s14 = smov 96   ;;  %vm524_vm6 = vcmask 254976   ;;  %s928_s25 = smov [#allocation8]  }
  0x22   : > { %482 = vmatpush.msra.mxu2 %v435_v10  ;;  %v439_v18 = vld [vmem:[%s1123_s4 + $0x18] sm:$0xff]  ;;  %v432_v19 = vld [vmem:[%s1122_s3] sm:$0xff]  ;;  %v438_v20 = vld [vmem:[%s1123_s4 + $0x10] sm:$0xff]  ;;  %s659_s26 = sshll.u32 %s928_s25, 4  ;;  %s661_s29 = sshll.u32 %s1128_s9, 4  ;;  %s660_s26 = int_to_ptr.vmem [resolvable:$true] %s659_s26  ;;  %s662_s29 = int_to_ptr.hbm [resolvable:$true] %s661_s29 }
  0x23   : > { %423 = vmatpush.msra.mxu0 %v401_v5  ;;  %459 = vmatpush.msra.mxu1 %v439_v18  ;;  %v437_v21 = vld [vmem:[%s1123_s4 + $0x8] sm:$0xff]  ;;  %v442_v22 = vld [vmem:[#allocation3] sm:$0x3]  ;;  %v441_v24 = vld [vmem:[#allocation2] sm:$0x3]  ;;  %p777_p9 = scmp.eq.s32.totalorder %s742_s12, 7 }
  0x24   : > { %483 = vmatpush.msra.mxu2 %v434_v11  ;;  %v436_v23 = vld [vmem:[%s1123_s4] sm:$0xff]  ;;  %500 = vrot.lane.b32.xlu1 %v442_v22, %s925_s24  ;;  %v534_v50 = vld [vmem:[%s1125_s6 + $0x18] sm:$0xff]  ;;  %v533_v52 = vld [vmem:[%s1125_s6 + $0x10] sm:$0xff] }
  0x25   : > { %424 = vmatpush.msra.mxu0 %v400_v6  ;;  %460 = vmatpush.msra.mxu1 %v438_v20  ;;  %v815_v27 = vld [vmem:[%s1124_s5] ss:$0 sm:$0xff]  ;;  %v543_v39 = vld [vmem:[#allocation3 + $0x2] sm:$0x3]  ;;  %v536_v51 = vld [vmem:[#allocation5 + $0x8] sm:$0xff] }
  0x26   : > { %484 = vmatpush.msra.mxu2 %v433_v12  ;;  %v629_v38 = vld [vmem:[%s1120_s1] sm:$0x3]  ;;  %v538_v48 = vld [vmem:[#allocation5 + $0x18] sm:$0xff]  ;;  %v535_v54 = vld [vmem:[#allocation5] sm:$0xff] }
  0x27   : > { %425 = vmatpush.msra.mxu0 %v399_v7  ;;  %461 = vmatpush.msra.mxu1 %v437_v21  ;;  %v758_v40 = vadd.s32 4294967295, %v629_v38  ;;  %v537_v49 = vld [vmem:[#allocation5 + $0x10] sm:$0xff]  ;;  %v532_v53 = vld [vmem:[%s1125_s6 + $0x8] sm:$0xff]  ;;  %v541_v55 = vld [vmem:[#allocation2 + $0x2] sm:$0x3] }
  0x28   : > { %485 = vmatpush.msra.mxu2 %v432_v19  ;;  %559 = vmatpush.msra.mxu3 %v538_v48  ;;  %v531_v56 = vld [vmem:[%s1125_s6] sm:$0xff]  ;;  %v633_v11 = vld [vmem:[#allocation4] sm:$0x3] }
  0x29   : > { %426 = vmatpush.msra.mxu0 %v398_v8  ;;  %462 = vmatpush.msra.mxu1 %v436_v23  ;;  %vm632_vm5 = vcmp.eq.s32.totalorder %v758_v40, %v631_v41  ;;  %v816_v0 = vld [vmem:[%s1127_s8] ss:$0 sm:$0xff] }
  0x2a   : > { %754 = vmatmul.msk.f32.vlgmr.msra.gmra.mxu1 %vm443_vm4, %v441_v24  ;;  %v634_v42 = vsel %vm632_vm5, 1, %v923_v3  ;;  %560 = vmatpush.msra.mxu3 %v537_v49 }
  0x2b   : > { %427 = vmatpush.msra.mxu0 %v397_v9  ;;  %581 = vmatpush.msrb.mxu1 %v534_v50 }
  0x2c   : > { %561 = vmatpush.msra.mxu3 %v536_v51 }
  0x2d   : > { %582 = vmatpush.msrb.mxu1 %v533_v52 }
  0x2e   : > { %562 = vmatpush.msra.mxu3 %v535_v54 }
  0x2f   : > { %583 = vmatpush.msrb.mxu1 %v532_v53  ;;  %756 = vmatmul.msk.f32.vlgmr.msra.gmra.mxu3 %vm443_vm4, %v541_v55 }
  0x31   : > { %584 = vmatpush.msrb.mxu1 %v531_v56 }
  0x92   : > { %v393_v15 = vpop.permute.xlu0 %392 }
  0x93   : > { %vm394_vm3 = vcmp.eq.s32.totalorder %v393_v15, %v390_v14 }
  0x94   : > { %v751_v17 = vsel %vm394_vm3, 1.0, %v924_v16 }
  0x95   : > { %753 = vmatmul.msk.f32.vlgmr.msra.gmra.mxu0 %vm404_vm2, %v751_v17 }
  0x96   : > { %v501_v43 = vpop.permute.xlu1 %500 }
  0xa7   : > { %v464_v26 = vpop.f32.mrf.mxu1 }
  0xb2   : > { %v564_v63 = vpop.f32.mrf.mxu3 }
 0x112   : > { %v429_v25 = vpop.f32.mrf.mxu0 }
 0x113   : > { %755 = vmatmul.msk.f32.vlgmr.msra.gmra.mxu2 %vm443_vm4, %v429_v25 }
 0x196   : > { %v487_v28 = vpop.f32.mrf.mxu2 }
 0x197   : > { %v488_v29 = vadd.f32 %v487_v28, %v464_v26 }
 0x199   : > { %v493_v30 = vadd.f32 %v815_v27, %v488_v29 }
 0x19b   : > { %817 = vtanh.f32 %v493_v30  ;;  %v494_v32 = vmul.f32 0.5, %v493_v30 }
 0x19d   : > { %819 = vtanh.f32 %v494_v32 }
 0x1a1   : > { %v818_v31 = vpop.eup %817 }
 0x1a2   : > { %505 = vrot.lane.b32.xlu0 %v818_v31, %s926_s27 }
 0x1a3   : > { %v820_v33 = vpop.eup %819 }
 0x1a4   : > { %v496_v34 = vadd.f32 1.0, %v820_v33 }
 0x1a6   : > { %v497_v35 = vmul.f32 0.5, %v496_v34 }
 0x1a8   : > { %v503_v44 = vmul.f32 %v501_v43, %v497_v35 }
 0x214   : > { %v506_v36 = vpop.permute.xlu0 %505 }
 0x215   : > { %v508_v37 = vmul.f32 %v506_v36, %v497_v35 }
 0x217   : > { %510 = vrot.lane.b32.xlu1 %v508_v37, %s925_s24 }
 0x21f   : > { %599 = vrot.lane.b32.xlu1 %v543_v39, %s925_s24 }
 0x227   : > { %636 = vperm.xlu1 %814, %v634_v42  }
 0x289   : > { %v511_v45 = vpop.permute.xlu1 %510 }
 0x28a   : > { %v513_v46 = vadd.f32 %v511_v45, %v503_v44 }
 0x28c   : > { %821 = vtanh.f32 %v513_v46  ;;  %527 = vrot.lane.b32.xlu1 %v513_v46, %s927_s14 }
 0x291   : > { %v600_v57 = vpop.permute.xlu1 %599 }
 0x292   : > { %v822_v47 = vpop.eup %821 }
 0x293   : > { %516 = vrot.lane.b32.xlu2 %v822_v47, %s926_s27 }
 0x299   : > { %v637_v60 = vpop.permute.xlu1 %636 }
 0x29a   : > { %vm638_vm7 = vcmp.eq.s32.totalorder %v637_v60, 1 }
 0x2ed   : > { %v517_v58 = vpop.permute.xlu2 %516 }
 0x2ee   : > { %v519_v59 = vmul.f32 %v517_v58, %v497_v35 }
 0x2f0   : > { %521 = vrot.lane.b32.xlu2 %v519_v59, %s925_s24 }
 0x2fe   : > { %v528_v61 = vpop.permute.xlu1 %527 }
 0x2ff   : > { %530 = vst.msk [vmem:[#allocation3] sm:$0x3] %vm524_vm6, %v528_v61 }
 0x34a   : > { %v522_v62 = vpop.permute.xlu2 %521 }
 0x34b   : > { %525 = vst.msk [vmem:[#allocation2] sm:$0x3] %vm524_vm6, %v522_v62  ;;  %757 = vmatmul.msk.f32.vlgmr.msrb.gmra.mxu1 %vm443_vm4, %v522_v62 }
 0x3c8   : > { %v586_v1 = vpop.f32.mrf.mxu1 }
 0x3c9   : > { %v587_v2 = vadd.f32 %v586_v1, %v564_v63 }
 0x3cb   : > { %v592_v3 = vadd.f32 %v816_v0, %v587_v2 }
 0x3cd   : > { %823 = vtanh.f32 %v592_v3  ;;  %v593_v5 = vmul.f32 0.5, %v592_v3 }
 0x3cf   : > { %825 = vtanh.f32 %v593_v5 }
 0x3d3   : > { %v824_v4 = vpop.eup %823 }
 0x3d4   : > { %604 = vrot.lane.b32.xlu0 %v824_v4, %s926_s27 }
 0x3d5   : > { %v826_v6 = vpop.eup %825 }
 0x3d6   : > { %v595_v7 = vadd.f32 1.0, %v826_v6 }
 0x3d8   : > { %v596_v8 = vmul.f32 0.5, %v595_v7 }
 0x3da   : > { %v602_v12 = vmul.f32 %v600_v57, %v596_v8 }
 0x446   : > { %v605_v9 = vpop.permute.xlu0 %604 }
 0x447   : > { %v607_v10 = vmul.f32 %v605_v9, %v596_v8 }
 0x449   : > { %609 = vrot.lane.b32.xlu2 %v607_v10, %s925_s24 }
 0x451   : > { %640 = vrot.lane.b32.xlu2 %v633_v11, %s927_s14 }
 0x4a3   : > { %v610_v13 = vpop.permute.xlu2 %609 }
 0x4a4   : > { %v612_v14 = vadd.f32 %v610_v13, %v602_v12 }
 0x4a6   : > { %827 = vtanh.f32 %v612_v14 }
 0x4ab   : > { %v641_v17 = vpop.permute.xlu2 %640 }
 0x4ac   : > { %v828_v15 = vpop.eup %827 }
 0x4ad   : > { %615 = vrot.lane.b32.xlu0 %v828_v15, %s926_s27 }
 0x51f   : > { %v616_v16 = vpop.permute.xlu0 %615 }
 0x520   : > { %v618_v18 = vmul.f32 %v616_v16, %v596_v8 }
 0x522   : > { %620 = vrot.lane.b32.xlu2 %v618_v18, %s925_s24  ;;  %v643_v19 = vsel %vm638_vm7, %v618_v18, %v641_v17 }
 0x523   : > { %645 = vrot.lane.b32.xlu0 %v643_v19, %s925_s24 }
 0x52b   : > { %625 = vrot.lane.b32.xlu0 %v612_v14, %s927_s14 }
 0x57c   : > { %v621_v20 = vpop.permute.xlu2 %620 }
 0x57d   : > { %623 = vst.msk [vmem:[#allocation2 + $0x2] sm:$0x3] %vm524_vm6, %v621_v20 }
 0x595   : > { %v646_v21 = vpop.permute.xlu0 %645 }
 0x596   : > { %648 = vst.msk [vmem:[#allocation4] sm:$0x3] %vm524_vm6, %v646_v21 }
 0x59d   : > { %v626_v22 = vpop.permute.xlu0 %625  ;;  %v649_v23 = vld [vmem:[#allocation4] sm:$0x3] }
 0x59e   : > { %628 = vst.msk [vmem:[#allocation3 + $0x2] sm:$0x3] %vm524_vm6, %v626_v22 }
 0x59f   : > { %650 = vst.msk [vmem:[#allocation8] sm:$0x3] %vm524_vm6, %v649_v23 }
 0x5a0   : > { %768 = dma.vmem_to_hbm [thread:$0]  (%p777_p9), %s660_s26, 32, %s662_s29, [#allocation7]  }
 0x5a1   : > { %904 = dma.done.wait (%p777_p9), [#allocation7], 32  }
 0x5a2   : > { %906 = vsyncadd (%p777_p9), [#allocation7], 4294967264 }
 0x5a3 PF: > { %s21_s11 = sadd.s32 1, %s917_s11   ;;  %s1129_s30 = smov %s913_s10 }
 0x5a4   : > { %p18_p10 = scmp.ge.s32.totalorder %s21_s11, 10   ;;  %s1130_s10 = smov %s1132_s13 }
 0x5a6   :  { %20 = sbr.rel (!%p18_p10) target bundleno = 3 (0x3), region = 98 }
 0x5ab   :  { %675 = vsyncpa [#allocation6], 1 }
 0x5ac   :  { %677 = vsyncpa [#allocation6 + $0x1], 1 }
 0x5ad   :  { %678 = vsyncpa [#allocation7], 1 }
 0x5ae   :  { %680 = vsyncpa [#allocation7 + $0x1], 1 }

</bundles_post_ra>
